<compile_context>
chip_gen: v7x
topology: tpu7x:2x2x1
jax: 0.10.0
libtpu: 0.0.40
codegen_flags: <defaults>
</compile_context>

<pallas_src>
import functools

import jax
import jax.numpy as jnp
from jax.experimental import pallas as pl
from jax.experimental.pallas import tpu as pltpu


def _round_up(x, m):
    return ((x + m - 1) // m) * m


# ----------------------------------------------------------------------------
# Fused kernel: per-block partial sums of cross-entropy loss and of
# accuracy(argmax(logits), label).
#   logits_ref: (N, tile_t) native dtype (class-major, lane-dense over T)
#   labels_ref: (1, tile_t) int32
#   loss_ref, acc_ref: (1, 8, 128) f32 per-step partial-sum output blocks
# ----------------------------------------------------------------------------
def _fused_loss_acc_kernel(logits_ref, labels_ref, loss_ref, acc_ref, *, t_total):
    step = pl.program_id(0)
    raw = logits_ref[...]                               # (N, tile_t), native dtype
    labels = labels_ref[...]                            # (1, tile_t) int32
    n, tile_t = raw.shape

    class_ids = jax.lax.broadcasted_iota(jnp.int32, (n, tile_t), 0)

    # max / argmax / first-index tie-break in the input dtype (bf16 stays bf16).
    m = jnp.max(raw, axis=0, keepdims=True)                         # (1, tile_t)
    pred = jnp.min(jnp.where(raw == m, class_ids, n), axis=0, keepdims=True)

    # Numerically stable log-softmax pieces in f32 (class axis = sublanes).
    shifted = raw.astype(jnp.float32) - m.astype(jnp.float32)       # (N, tile_t)
    lse = jnp.log(jnp.sum(jnp.exp(shifted), axis=0, keepdims=True))  # (1, tile_t)
    picked = jnp.sum(jnp.where(class_ids == labels, shifted, 0.0),
                     axis=0, keepdims=True)                          # (1, tile_t)
    per_sample = lse - picked                                        # (1, tile_t)
    correct = (pred == labels).astype(jnp.float32)                   # (1, tile_t)

    # Fast path: interior blocks are always fully valid -> no masking math.
    loss_ref[...] = jnp.broadcast_to(jnp.sum(per_sample), loss_ref.shape)
    acc_ref[...] = jnp.broadcast_to(jnp.sum(correct), acc_ref.shape)

    # Ragged tail: only exists when T % tile_t != 0; only the last step needs it.
    if t_total % tile_t != 0:
        @pl.when(step == pl.num_programs(0) - 1)
        def _mask_tail():
            col = jax.lax.broadcasted_iota(jnp.int32, (1, tile_t), 1) + step * tile_t
            valid = col < t_total
            # jnp.where, not multiply: OOB tail garbage may be inf/NaN.
            loss_ref[...] = jnp.broadcast_to(
                jnp.sum(jnp.where(valid, per_sample, 0.0)), loss_ref.shape)
            acc_ref[...] = jnp.broadcast_to(
                jnp.sum(jnp.where(valid, correct, 0.0)), acc_ref.shape)


def _run_fused(logits_cm, labels_row, t, tile_t):
    """logits_cm: (N, T) class-major, native dtype.  labels_row: (1, T) int32."""
    n = logits_cm.shape[0]
    tile_t = max(128, min(int(tile_t), _round_up(t, 128)))
    tile_t = _round_up(tile_t, 128)
    grid_t = pl.cdiv(t, tile_t)

    kernel = functools.partial(_fused_loss_acc_kernel, t_total=t)
    loss_parts, acc_parts = pl.pallas_call(
        kernel,
        out_shape=(jax.ShapeDtypeStruct((grid_t, 8, 128), jnp.float32),
                   jax.ShapeDtypeStruct((grid_t, 8, 128), jnp.float32)),
        grid=(grid_t,),
        in_specs=[
            pl.BlockSpec((n, tile_t), lambda i: (0, i)),
            pl.BlockSpec((1, tile_t), lambda i: (0, i)),
        ],
        out_specs=(pl.BlockSpec((1, 8, 128), lambda i: (i, 0, 0)),
                   pl.BlockSpec((1, 8, 128), lambda i: (i, 0, 0))),
        compiler_params=pltpu.CompilerParams(
            dimension_semantics=("parallel",),      # v7x: grid splits over both TCs
            vmem_limit_bytes=48 * 1024 * 1024),
    )(logits_cm, labels_row)

    inv_t = jnp.float32(1.0 / t)
    loss = jnp.sum(loss_parts[:, 0, 0]) * inv_t
    acc = jnp.sum(acc_parts[:, 0, 0]) * inv_t
    return loss, acc


def few_shot_loss_and_accuracy(logits, label, *, tile_t=32768):
    """Fused FewShotREModel.loss(logits, label) + accuracy(argmax(logits), label).

    logits: (..., N) sample-major, as in the PyTorch module; native dtype kept.
    """
    n = logits.shape[-1]
    logits2d = jnp.reshape(logits, (-1, n))                 # glue: .view(-1, N)
    labels1d = jnp.reshape(label, (-1,)).astype(jnp.int32)  # glue: .view(-1)
    t = logits2d.shape[0]
    # Single relayout pass to the compute-optimal class-major layout (see header
    # note); skipped entirely by few_shot_loss_and_accuracy_class_major().
    logits_cm = jnp.transpose(logits2d)                     # (N, T)
    labels_row = jnp.reshape(labels1d, (1, t))
    return _run_fused(logits_cm, labels_row, t, tile_t)


def few_shot_loss_and_accuracy_class_major(logits_cm, label, *, tile_t=32768):
    """Same computation, but logits are already class-major with shape (N, T).

    Preferred entry point when the upstream classifier can emit class-major
    logits: no wrapper-side transpose / extra HBM pass.
    """
    _, t = logits_cm.shape
    labels_row = jnp.reshape(label, (1, t)).astype(jnp.int32)
    return _run_fused(logits_cm, labels_row, t, tile_t)


def few_shot_loss(logits, label, *, tile_t=32768):
    """Equivalent of FewShotREModel.loss (CrossEntropyLoss, mean reduction)."""
    loss, _ = few_shot_loss_and_accuracy(logits, label, tile_t=tile_t)
    return loss


# ----------------------------------------------------------------------------
# Standalone accuracy kernel (module semantics: pred supplied externally).
# Inputs reshaped to (8, W) int32 (all 8 sublanes used), lane grid over W.
# ----------------------------------------------------------------------------
def _accuracy_kernel(pred_ref, label_ref, out_ref, *, t_total, w_total):
    step = pl.program_id(0)
    pred = pred_ref[...]                                    # (8, tile_w) int32
    label = label_ref[...]
    rows, tile_w = pred.shape
    row = jax.lax.broadcasted_iota(jnp.int32, (rows, tile_w), 0)
    col = jax.lax.broadcasted_iota(jnp.int32, (rows, tile_w), 1) + step * tile_w
    valid = row * w_total + col < t_total                   # mask zero-padding
    eq = jnp.where(valid, (pred == label).astype(jnp.float32), 0.0)
    out_ref[...] = jnp.broadcast_to(jnp.sum(eq), out_ref.shape)


def few_shot_accuracy(pred, label, *, tile_w=32768):
    """Equivalent of FewShotREModel.accuracy."""
    pred1d = jnp.reshape(pred, (-1,)).astype(jnp.int32)
    label1d = jnp.reshape(label, (-1,)).astype(jnp.int32)
    t = pred1d.shape[0]

    # (8, W) layout; W is a multiple of tile_w so blocks divide exactly.
    w = _round_up(pl.cdiv(t, 8), 128)
    tile_w = max(128, min(int(tile_w), w))
    tile_w = _round_up(tile_w, 128)
    w = _round_up(w, tile_w)
    t_pad = 8 * w
    grid_w = w // tile_w

    pred2d = jnp.pad(pred1d, (0, t_pad - t)).reshape(8, w)
    label2d = jnp.pad(label1d, (0, t_pad - t)).reshape(8, w)

    kernel = functools.partial(_accuracy_kernel, t_total=t, w_total=w)
    parts = pl.pallas_call(
        kernel,
        out_shape=jax.ShapeDtypeStruct((grid_w, 8, 128), jnp.float32),
        grid=(grid_w,),
        in_specs=[pl.BlockSpec((8, tile_w), lambda i: (0, i)),
                  pl.BlockSpec((8, tile_w), lambda i: (0, i))],
        out_specs=pl.BlockSpec((1, 8, 128), lambda i: (i, 0, 0)),
        compiler_params=pltpu.CompilerParams(dimension_semantics=("parallel",)),
    )(pred2d, label2d)
    return jnp.sum(parts[:, 0, 0]) * jnp.float32(1.0 / t)


# ----------------------------------------------------------------------------
# Pure-JAX references (correctness check)
# ----------------------------------------------------------------------------
def _ref_ce_loss(logits, label):
    n = logits.shape[-1]
    lg = jnp.reshape(logits, (-1, n)).astype(jnp.float32)
    lb = jnp.reshape(label, (-1,)).astype(jnp.int32)
    logp = jax.nn.log_softmax(lg, axis=-1)
    return -jnp.mean(jnp.take_along_axis(logp, lb[:, None], axis=1))


def _ref_accuracy(pred, label):
    return jnp.mean((jnp.reshape(pred, (-1,)) == jnp.reshape(label, (-1,))).astype(jnp.float32))


# ----------------------------------------------------------------------------
if __name__ == "__main__":
    key = jax.random.PRNGKey(0)
    k_logits, k_label = jax.random.split(key, 2)

    # Few-shot-style small shapes: B=2 episodes, N*Q=4 queries each, N=5 classes.
    B, TQ, N = 2, 4, 5
    logits = jax.random.normal(k_logits, (B, TQ, N), dtype=jnp.float32)
    label = jax.random.randint(k_label, (B, TQ), 0, N, dtype=jnp.int32)
    pred = jnp.argmax(logits, axis=-1).astype(jnp.int32)

    # Fused loss + accuracy (pred computed in-kernel).
    loss_val, acc_val = jax.block_until_ready(few_shot_loss_and_accuracy(logits, label))
    # Standalone accuracy (module semantics: external pred).
    acc_standalone = jax.block_until_ready(few_shot_accuracy(pred, label))

    ref_loss = _ref_ce_loss(logits, label)
    ref_acc = _ref_accuracy(pred, label)
    assert jnp.allclose(loss_val, ref_loss, atol=1e-5, rtol=1e-5), (loss_val, ref_loss)
    assert jnp.allclose(acc_val, ref_acc, atol=1e-6), (acc_val, ref_acc)
    assert jnp.allclose(acc_standalone, ref_acc, atol=1e-6), (acc_standalone, ref_acc)

    # Class-major fast path (skips the wrapper transpose).
    loss_cm, acc_cm = jax.block_until_ready(
        few_shot_loss_and_accuracy_class_major(
            jnp.transpose(jnp.reshape(logits, (-1, N))), label))
    assert jnp.allclose(loss_cm, ref_loss, atol=1e-5, rtol=1e-5), (loss_cm, ref_loss)
    assert jnp.allclose(acc_cm, ref_acc, atol=1e-6), (acc_cm, ref_acc)

    # Native-dtype (bf16) logits path: no wrapper upcast; max/argmax stay bf16.
    logits_bf16 = logits.astype(jnp.bfloat16)
    loss_bf16, acc_bf16 = jax.block_until_ready(
        few_shot_loss_and_accuracy(logits_bf16, label))
    ref_loss_bf16 = _ref_ce_loss(logits_bf16, label)
    assert jnp.allclose(loss_bf16, ref_loss_bf16, atol=1e-4, rtol=1e-4), (loss_bf16, ref_loss_bf16)
    assert jnp.allclose(acc_bf16, acc_val, atol=1e-6), (acc_bf16, acc_val)

    # Multi-block path: exercises the parallel grid + ragged-tail masking.
    T2, N2 = 1000, 7
    k1, k2 = jax.random.split(jax.random.PRNGKey(1))
    big_logits = jax.random.normal(k1, (T2, N2), dtype=jnp.float32)
    big_label = jax.random.randint(k2, (T2,), 0, N2, dtype=jnp.int32)
    big_loss, big_acc = jax.block_until_ready(
        few_shot_loss_and_accuracy(big_logits, big_label, tile_t=256))
    ref_big_loss = _ref_ce_loss(big_logits, big_label)
    ref_big_acc = _ref_accuracy(jnp.argmax(big_logits, -1), big_label)
    assert jnp.allclose(big_loss, ref_big_loss, atol=1e-5, rtol=1e-5), (big_loss, ref_big_loss)
    assert jnp.allclose(big_acc, ref_big_acc, atol=1e-6), (big_acc, ref_big_acc)

    print("KERNEL_OK")
</pallas_src>

<mosaic_0001>
module attributes {stable_mosaic.version = 11 : i64} {
  func.func @_fused_loss_acc_kernel(%arg0: i32, %arg1: memref<5x128xf32, #tpu.memory_space<vmem>>, %arg2: memref<1x128xi32, #tpu.memory_space<vmem>>, %arg3: memref<1x8x128xf32, #tpu.memory_space<vmem>>, %arg4: memref<1x8x128xf32, #tpu.memory_space<vmem>>) attributes {dimension_semantics = [#tpu.dimension_semantics<parallel>], iteration_bounds = array<i64: 1>, scalar_prefetch = 0 : i64, scratch_operands = 0 : i64, tpu.core_type = #tpu.core_type<tc>, window_params = [{transform_indices = @transform_0, window_bounds = array<i64: 5, 128>}, {transform_indices = @transform_1, window_bounds = array<i64: 1, 128>}, {transform_indices = @transform_2, window_bounds = array<i64: 1, 8, 128>}, {transform_indices = @transform_3, window_bounds = array<i64: 1, 8, 128>}]} {
    %c0 = arith.constant 0 : index
    %c0_0 = arith.constant 0 : index
    %0 = vector.load %arg1[%c0, %c0_0] : memref<5x128xf32, #tpu.memory_space<vmem>>, vector<5x128xf32>
    %c0_1 = arith.constant 0 : index
    %c0_2 = arith.constant 0 : index
    %1 = vector.load %arg2[%c0_1, %c0_2] : memref<1x128xi32, #tpu.memory_space<vmem>>, vector<1x128xi32>
    %2 = tpu.iota {dimensions = array<i32: 0>} : vector<5x128xi32>
    %cst = arith.constant dense<0xFF800000> : vector<128xf32>
    %3 = vector.multi_reduction <maximumf>, %0, %cst [0] : vector<5x128xf32> to vector<128xf32>
    %4 = vector.shape_cast %3 : vector<128xf32> to vector<1x128xf32>
    %5 = vector.broadcast %4 : vector<1x128xf32> to vector<5x128xf32>
    %6 = arith.cmpf oeq, %0, %5 : vector<5x128xf32>
    %c5_i32 = arith.constant 5 : i32
    %7 = vector.broadcast %c5_i32 : i32 to vector<5x128xi32>
    %8 = arith.select %6, %2, %7 : vector<5x128xi1>, vector<5x128xi32>
    %cst_3 = arith.constant dense<2147483647> : vector<128xi32>
    %9 = vector.multi_reduction <minsi>, %8, %cst_3 [0] : vector<5x128xi32> to vector<128xi32>
    %10 = vector.shape_cast %9 : vector<128xi32> to vector<1x128xi32>
    %11 = vector.broadcast %4 : vector<1x128xf32> to vector<5x128xf32>
    %12 = arith.subf %0, %11 : vector<5x128xf32>
    %13 = math.exp %12 : vector<5x128xf32>
    %cst_4 = arith.constant dense<0.000000e+00> : vector<128xf32>
    %14 = vector.multi_reduction <add>, %13, %cst_4 [0] : vector<5x128xf32> to vector<128xf32>
    %15 = vector.shape_cast %14 : vector<128xf32> to vector<1x128xf32>
    %16 = math.log %15 : vector<1x128xf32>
    %17 = vector.broadcast %1 : vector<1x128xi32> to vector<5x128xi32>
    %18 = arith.cmpi eq, %2, %17 : vector<5x128xi32>
    %cst_5 = arith.constant 0.000000e+00 : f32
    %19 = vector.broadcast %cst_5 : f32 to vector<5x128xf32>
    %20 = arith.select %18, %12, %19 : vector<5x128xi1>, vector<5x128xf32>
    %cst_6 = arith.constant dense<0.000000e+00> : vector<128xf32>
    %21 = vector.multi_reduction <add>, %20, %cst_6 [0] : vector<5x128xf32> to vector<128xf32>
    %22 = vector.shape_cast %21 : vector<128xf32> to vector<1x128xf32>
    %23 = arith.subf %16, %22 : vector<1x128xf32>
    %24 = arith.cmpi eq, %10, %1 : vector<1x128xi32>
    %25 = arith.extui %24 : vector<1x128xi1> to vector<1x128xi32>
    %26 = arith.sitofp %25 : vector<1x128xi32> to vector<1x128xf32>
    %27 = vector.shape_cast %23 : vector<1x128xf32> to vector<1x1x128xf32>
    %cst_7 = arith.constant dense<0.000000e+00> : vector<1xf32>
    %28 = vector.multi_reduction <add>, %27, %cst_7 [1, 2] : vector<1x1x128xf32> to vector<1xf32>
    %29 = vector.shape_cast %28 : vector<1xf32> to vector<1x1x1xf32>
    %30 = vector.extract %29[0, 0, 0] : f32 from vector<1x1x1xf32>
    %31 = vector.broadcast %30 : f32 to vector<1x8x128xf32>
    %c0_8 = arith.constant 0 : index
    %c0_9 = arith.constant 0 : index
    %c0_10 = arith.constant 0 : index
    %32 = vector.load %arg3[%c0_8, %c0_9, %c0_10] : memref<1x8x128xf32, #tpu.memory_space<vmem>>, vector<1x8x128xf32>
    tpu.vector_store %arg3[%c0_8, %c0_9, %c0_10], %31 {strides = array<i32>} : memref<1x8x128xf32, #tpu.memory_space<vmem>>, vector<1x8x128xf32>,
    %33 = vector.shape_cast %26 : vector<1x128xf32> to vector<1x1x128xf32>
    %cst_11 = arith.constant dense<0.000000e+00> : vector<1xf32>
    %34 = vector.multi_reduction <add>, %33, %cst_11 [1, 2] : vector<1x1x128xf32> to vector<1xf32>
    %35 = vector.shape_cast %34 : vector<1xf32> to vector<1x1x1xf32>
    %36 = vector.extract %35[0, 0, 0] : f32 from vector<1x1x1xf32>
    %37 = vector.broadcast %36 : f32 to vector<1x8x128xf32>
    %c0_12 = arith.constant 0 : index
    %c0_13 = arith.constant 0 : index
    %c0_14 = arith.constant 0 : index
    %38 = vector.load %arg4[%c0_12, %c0_13, %c0_14] : memref<1x8x128xf32, #tpu.memory_space<vmem>>, vector<1x8x128xf32>
    tpu.vector_store %arg4[%c0_12, %c0_13, %c0_14], %37 {strides = array<i32>} : memref<1x8x128xf32, #tpu.memory_space<vmem>>, vector<1x8x128xf32>,
    %c0_i32 = arith.constant 0 : i32
    %39 = arith.cmpi eq, %arg0, %c0_i32 : i32
    %40 = arith.extui %39 : i1 to i32
    %c0_i32_15 = arith.constant 0 : i32
    %41 = arith.cmpi ne, %40, %c0_i32_15 : i32
    scf.if %41 {
      %42 = tpu.iota {dimensions = array<i32: 1>} : vector<1x128xi32>
      %c128_i32 = arith.constant 128 : i32
      %43 = arith.muli %arg0, %c128_i32 : i32
      %44 = vector.broadcast %43 : i32 to vector<1x128xi32>
      %45 = arith.addi %42, %44 : vector<1x128xi32>
      %c8_i32 = arith.constant 8 : i32
      %46 = vector.broadcast %c8_i32 : i32 to vector<1x128xi32>
      %47 = arith.cmpi slt, %45, %46 : vector<1x128xi32>
      %cst_16 = arith.constant 0.000000e+00 : f32
      %48 = vector.broadcast %cst_16 : f32 to vector<1x128xf32>
      %49 = arith.select %47, %23, %48 : vector<1x128xi1>, vector<1x128xf32>
      %50 = vector.shape_cast %49 : vector<1x128xf32> to vector<1x1x128xf32>
      %cst_17 = arith.constant dense<0.000000e+00> : vector<1xf32>
      %51 = vector.multi_reduction <add>, %50, %cst_17 [1, 2] : vector<1x1x128xf32> to vector<1xf32>
      %52 = vector.shape_cast %51 : vector<1xf32> to vector<1x1x1xf32>
      %53 = vector.extract %52[0, 0, 0] : f32 from vector<1x1x1xf32>
      %54 = vector.broadcast %53 : f32 to vector<1x8x128xf32>
      %c0_18 = arith.constant 0 : index
      %c0_19 = arith.constant 0 : index
      %c0_20 = arith.constant 0 : index
      %55 = vector.load %arg3[%c0_18, %c0_19, %c0_20] : memref<1x8x128xf32, #tpu.memory_space<vmem>>, vector<1x8x128xf32>
      tpu.vector_store %arg3[%c0_18, %c0_19, %c0_20], %54 {strides = array<i32>} : memref<1x8x128xf32, #tpu.memory_space<vmem>>, vector<1x8x128xf32>,
      %cst_21 = arith.constant 0.000000e+00 : f32
      %56 = vector.broadcast %cst_21 : f32 to vector<1x128xf32>
      %57 = arith.select %47, %26, %56 : vector<1x128xi1>, vector<1x128xf32>
      %58 = vector.shape_cast %57 : vector<1x128xf32> to vector<1x1x128xf32>
      %cst_22 = arith.constant dense<0.000000e+00> : vector<1xf32>
      %59 = vector.multi_reduction <add>, %58, %cst_22 [1, 2] : vector<1x1x128xf32> to vector<1xf32>
      %60 = vector.shape_cast %59 : vector<1xf32> to vector<1x1x1xf32>
      %61 = vector.extract %60[0, 0, 0] : f32 from vector<1x1x1xf32>
      %62 = vector.broadcast %61 : f32 to vector<1x8x128xf32>
      %c0_23 = arith.constant 0 : index
      %c0_24 = arith.constant 0 : index
      %c0_25 = arith.constant 0 : index
      %63 = vector.load %arg4[%c0_23, %c0_24, %c0_25] : memref<1x8x128xf32, #tpu.memory_space<vmem>>, vector<1x8x128xf32>
      tpu.vector_store %arg4[%c0_23, %c0_24, %c0_25], %62 {strides = array<i32>} : memref<1x8x128xf32, #tpu.memory_space<vmem>>, vector<1x8x128xf32>,
    } else {
    }
    return
  }
  func.func @transform_0(%arg0: i32) -> (i32, i32) {
    %c0_i32 = arith.constant 0 : i32
    %c0_i32_0 = arith.constant 0 : i32
    return %c0_i32, %arg0 : i32, i32
  }
  func.func @transform_1(%arg0: i32) -> (i32, i32) {
    %c0_i32 = arith.constant 0 : i32
    %c0_i32_0 = arith.constant 0 : i32
    return %c0_i32, %arg0 : i32, i32
  }
  func.func @transform_2(%arg0: i32) -> (i32, i32, i32) {
    %c0_i32 = arith.constant 0 : i32
    %c0_i32_0 = arith.constant 0 : i32
    %c0_i32_1 = arith.constant 0 : i32
    return %arg0, %c0_i32, %c0_i32_0 : i32, i32, i32
  }
  func.func @transform_3(%arg0: i32) -> (i32, i32, i32) {
    %c0_i32 = arith.constant 0 : i32
    %c0_i32_0 = arith.constant 0 : i32
    %c0_i32_1 = arith.constant 0 : i32
    return %arg0, %c0_i32, %c0_i32_0 : i32, i32, i32
  }
}

</mosaic_0001>

<bundles_post_ra>
// kernel: tpu_custom_call.1
= control target key start
LH: loop header
LB: loop body
LE: loop exit
PB: predicated region body
PF: predicated region fallthrough
CT: control target
= control target key end

     0   :  { %9 = vsyncpa [#allocation3], 0  ;;  %s333_s0 = inlined_call_operand.hbm [shape: f32[5,8], index: 0, kind: input, shape index: {}]   ;;  %s334_s1 = inlined_call_operand.vmem [shape: s32[1,8], index: 1, kind: input, shape index: {}]   ;;  %s335_s2 = inlined_call_operand.hbm [shape: f32[1,8,128], index: 2, kind: output, shape index: {0}]   ;;  %s336_s3 = inlined_call_operand.hbm [shape: f32[1,8,128], index: 3, kind: output, shape index: {1}]  }
   0x1   :  { %10 = vsyncpa [#allocation4], 0 }
   0x2   :  { %11 = vsyncpa [#allocation7], 0  ;;  %s259_s12 = smov [#allocation2]   ;;  %s187_s16 = scalar_lea.hbm %s333_s0, 128 }
   0x3   :  { %s18_s13 = sshll.u32 %s259_s12, 4  ;;  %p188_p0 = scmp.ne.s32.totalorder %s333_s0, %s187_s16  ;;  %s19_s13 = int_to_ptr.vmem [resolvable:$true] %s18_s13 }
   0x4   :  { %p191_p1 = scmp.lt.u32.totalorder %s187_s16, %s333_s0 }
   0x6   :  { %p193_p2 = pnand %p191_p1, %p188_p0 }
   0x8   :  { %196 = shalt.err (!%p193_p2)
}
   0x9   :  { %s197_s21 = scalar_lea.vmem %s19_s13, 128  ;;  %p202_p4 = scmp.lt.s32.totalorder %s19_s13, %s19_s13 }
   0xa   :  { %p198_p3 = scmp.ne.s32.totalorder %s19_s13, %s197_s21  ;;  %p203_p5 = scmp.lt.s32.totalorder %s197_s21, %s197_s21 }
   0xc   :  { %p204_p6 = por %p203_p5, %p202_p4 }
   0xe   :  { %p205_p7 = pnand %p204_p6, %p198_p3 }
  0x10   :  { %208 = shalt.err (!%p205_p7)
}
  0x11   :  { %21 = dma.hbm_to_vmem [thread:$0]  %s333_s0, 128, %s19_s13, [#allocation3]  }
  0x12   :  { %253 = dma.done.wait [#allocation3], 128  }
  0x13   :  { %254 = vsyncadd [#allocation3], 4294967168  ;;  %vm31_vm0 = vcmask 1044480   ;;  %v27_v0 = vld [vmem:[#allocation2] sm:$0x1f]  ;;  %v29_v4 = vlaneseq  ;;  %vm80_vm7 = vcmask 1040384  }
  0x14   :  { %v32_v1 = vsel %vm31_vm0, %v27_v0, -inf  ;;  %v28_v12 = vld [vmem:[%s334_s1] sm:$0x1]  ;;  %v260_v42 = vmov 0.0   ;;  %s261_s1 = smov [#allocation5]   ;;  %s262_s27 = smov [#allocation6]  }
  0x15   :  { %v33_v2 = vrot.slane %v32_v1, 4  ;;  %v30_v7 = vshrl.u32 %v29_v4, 7  ;;  %v110_v38 = vand.u32 127, %v29_v4  ;;  %s147_s26 = sshll.u32 %s261_s1, 4  ;;  %s157_s28 = sshll.u32 %s262_s27, 4  ;;  %s148_s26 = int_to_ptr.vmem [resolvable:$true] %s147_s26  ;;  %s302_s28 = int_to_ptr.vmem [resolvable:$true] %s157_s28 }
  0x16   :  { %s209_s5 = scalar_lea.vmem %s148_s26, 128  ;;  %p214_p9 = scmp.lt.s32.totalorder %s148_s26, %s148_s26 }
  0x17   :  { %v34_v3 = vmax.f32 %v32_v1, %v33_v2  ;;  %v65_v11 = vsub.s32 0, %v30_v7  ;;  %vm114_vm8 = vcmp.lt.s32.totalorder %v110_v38, 8  ;;  %p210_p8 = scmp.ne.s32.totalorder %s148_s26, %s209_s5  ;;  %p215_p10 = scmp.lt.s32.totalorder %s209_s5, %s209_s5 }
  0x19   :  { %v35_v5 = vrot.slane %v34_v3, 2  ;;  %v66_v15 = vrot.slane %v28_v12, %v65_v11  ;;  %p216_p11 = por %p215_p10, %p214_p9 }
  0x1b   :  { %v36_v6 = vmax.f32 %v34_v3, %v35_v5  ;;  %vm67_vm2 = vcmp.eq.s32.totalorder %v30_v7, %v66_v15  ;;  %p217_p12 = pnand %p216_p11, %p210_p8 }
  0x1d   :  { %v37_v8 = vrot.slane %v36_v6, 1 }
  0x1f   :  { %v38_v9 = vmax.f32 %v36_v6, %v37_v8 }
  0x21   :  { %v51_v10 = vsub.f32 %v27_v0, %v38_v9  ;;  %vm39_vm1 = vcmp.eq.f32.partialorder %v27_v0, %v38_v9 }
  0x22   :  { %v40_v13 = vsel %vm39_vm1, %v30_v7, 5 }
  0x23   :  { %v52_v14 = vmul.f32 1.442695, %v51_v10  ;;  %v41_v16 = vsel %vm31_vm0, %v40_v13, 2147483647  ;;  %v68_v18 = vsel %vm67_vm2, %v51_v10, 0.0 }
  0x24   :  { %v42_v17 = vrot.slane %v41_v16, 4  ;;  %v69_v20 = vsel %vm31_vm0, %v68_v18, 0.0 }
  0x25   :  { %183 = vpow2.f32 %v52_v14  ;;  %v70_v24 = vrot.slane %v69_v20, 4 }
  0x26   :  { %vm43_vm3 = vcmp.lt.s32.totalorder %v41_v16, %v42_v17 }
  0x27   :  { %v44_v21 = vsel %vm43_vm3, %v41_v16, %v42_v17  ;;  %v71_v28 = vadd.f32 %v70_v24, %v69_v20 }
  0x28   :  { %v45_v25 = vrot.slane %v44_v21, 2 }
  0x29   :  { %v72_v32 = vrot.slane %v71_v28, 2 }
  0x2a   :  { %vm46_vm4 = vcmp.lt.s32.totalorder %v44_v21, %v45_v25 }
  0x2b   :  { %v47_v31 = vsel %vm46_vm4, %v44_v21, %v45_v25  ;;  %v73_v35 = vadd.f32 %v72_v32, %v71_v28 }
  0x2c   :  { %v48_v34 = vrot.slane %v47_v31, 1 }
  0x2d   :  { %v74_v36 = vrot.slane %v73_v35, 1 }
  0x2e   :  { %vm49_vm5 = vcmp.lt.s32.totalorder %v47_v31, %v48_v34 }
  0x2f   :  { %v184_v19 = vpop.eup %183  ;;  %v50_v37 = vsel %vm49_vm5, %v47_v31, %v48_v34  ;;  %v75_v39 = vadd.f32 %v74_v36, %v73_v35 }
  0x30   :  { %v54_v22 = vsel %vm31_vm0, %v184_v19, 0.0  ;;  %vm77_vm6 = vcmp.eq.s32.totalorder %v50_v37, %v28_v12 }
  0x31   :  { %v55_v23 = vrot.slane %v54_v22, 4  ;;  %v170_v43 = vsel %vm77_vm6, 1.0, %v260_v42 }
  0x32   :  { %v128_v47 = vsel %vm114_vm8, %v170_v43, 0.0  ;;  %v93_v49 = vsel %vm80_vm7, %v170_v43, 0.0 }
  0x33   :  { %v56_v26 = vadd.f32 %v55_v23, %v54_v22  ;;  %v129_v50 = vsel %vm80_vm7, %v128_v47, 0.0 }
  0x35   :  { %v57_v27 = vrot.slane %v56_v26, 2 }
  0x37   :  { %v58_v29 = vadd.f32 %v57_v27, %v56_v26 }
  0x39   :  { %v59_v30 = vrot.slane %v58_v29, 1 }
  0x3b   :  { %v60_v33 = vadd.f32 %v59_v30, %v58_v29 }
  0x3d   :  { %185 = vlog2.f32 %v60_v33 }
  0x47   :  { %v186_v40 = vpop.eup %185 }
  0x48   :  { %v62_v41 = vmul.f32 0.6931472, %v186_v40 }
  0x4a   :  { %v76_v44 = vsub.f32 %v62_v41, %v75_v39 }
  0x4c   :  { %v81_v45 = vsel %vm80_vm7, %v76_v44, 0.0  ;;  %v115_v46 = vsel %vm114_vm8, %v76_v44, 0.0 }
  0x4d   :  { %82 = vadd.xlane.f32.xlu0 %v81_v45  ;;  %v116_v48 = vsel %vm80_vm7, %v115_v46, 0.0 }
  0x4e   :  { %117 = vadd.xlane.f32.xlu1 %v116_v48 }
  0x51   :  { %94 = vadd.xlane.f32.xlu0 %v93_v49 }
  0x52   :  { %130 = vadd.xlane.f32.xlu1 %v129_v50 }
  0xda   :  { %v83_v51 = vpop.xlane.xlu0 %82 }
  0xdb   :  { %v84_v52 = vrot.slane %v83_v51, 4  ;;  %v118_v53 = vpop.xlane.xlu1 %117 }
  0xdc   :  { %v119_v54 = vrot.slane %v118_v53, 4 }
  0xdd   :  { %v85_v55 = vadd.f32 %v84_v52, %v83_v51 }
  0xde   :  { %v120_v56 = vadd.f32 %v119_v54, %v118_v53  ;;  %v95_v57 = vpop.xlane.xlu0 %94 }
  0xdf   :  { %v86_v58 = vrot.slane %v85_v55, 2  ;;  %v96_v59 = vrot.slane %v95_v57, 4  ;;  %v131_v60 = vpop.xlane.xlu1 %130 }
  0xe0   :  { %v121_v61 = vrot.slane %v120_v56, 2  ;;  %v132_v62 = vrot.slane %v131_v60, 4 }
  0xe1   :  { %v97_v63 = vadd.f32 %v96_v59, %v95_v57  ;;  %v87_v0 = vadd.f32 %v86_v58, %v85_v55 }
  0xe2   :  { %v133_v1 = vadd.f32 %v132_v62, %v131_v60  ;;  %v122_v2 = vadd.f32 %v121_v61, %v120_v56 }
  0xe3   :  { %v98_v3 = vrot.slane %v97_v63, 2  ;;  %v88_v4 = vrot.slane %v87_v0, 1 }
  0xe4   :  { %v134_v5 = vrot.slane %v133_v1, 2  ;;  %v123_v9 = vrot.slane %v122_v2, 1 }
  0xe5   :  { %v99_v6 = vadd.f32 %v98_v3, %v97_v63  ;;  %v89_v7 = vadd.f32 %v88_v4, %v87_v0 }
  0xe6   :  { %v135_v8 = vadd.f32 %v134_v5, %v133_v1  ;;  %v124_v13 = vadd.f32 %v123_v9, %v122_v2 }
  0xe7   :  { %171 = vpush %v89_v7  ;;  %v100_v10 = vrot.slane %v99_v6, 1 }
  0xe8   :  { %v136_v11 = vrot.slane %v135_v8, 1 }
  0xe9   :  { %v101_v12 = vadd.f32 %v100_v10, %v99_v6 }
  0xea   :  { %v137_v14 = vadd.f32 %v136_v11, %v135_v8 }
  0xeb   :  { %173 = vpush %v101_v12 }
  0xec   :  { %175 = vpush %v124_v13 }
  0xed   :  { %177 = vpush %v137_v14 }
 0x118   :  { %s172_s0 = spop %171 }
 0x11c   :  { %s174_s29 = spop %173 }
 0x11d   :  { %s176_s30 = spop %175 }
 0x11e   :  { %v126_v15 = vstv %s176_s30  ;;  %s178_s4 = spop %177 }
 0x11f   :  { %127 = vst [vmem:[#allocation5] sm:$0xff] %v126_v15  ;;  %v139_v16 = vstv %s178_s4 }
 0x120   :  { %140 = vst [vmem:[#allocation6] sm:$0xff] %v139_v16 }
 0x121   :  { %220 = shalt.err (!%p217_p12)
}
 0x122   :  { %s221_s8 = scalar_lea.hbm %s335_s2, 128 }
 0x123   :  { %p222_p13 = scmp.ne.s32.totalorder %s335_s2, %s221_s8  ;;  %p225_p0 = scmp.lt.u32.totalorder %s221_s8, %s335_s2 }
 0x125   :  { %p227_p1 = pnand %p225_p0, %p222_p13 }
 0x127   :  { %230 = shalt.err (!%p227_p1)
}
 0x128   :  { %150 = dma.vmem_to_hbm [thread:$0]  %s148_s26, 128, %s335_s2, [#allocation4]  }
 0x129   :  { %s231_s15 = scalar_lea.vmem %s302_s28, 128  ;;  %p236_p3 = scmp.lt.s32.totalorder %s302_s28, %s302_s28 }
 0x12a   :  { %p232_p2 = scmp.ne.s32.totalorder %s302_s28, %s231_s15  ;;  %p237_p4 = scmp.lt.s32.totalorder %s231_s15, %s231_s15 }
 0x12c   :  { %p238_p5 = por %p237_p4, %p236_p3 }
 0x12e   :  { %p239_p6 = pnand %p238_p5, %p232_p2 }
 0x130   :  { %242 = shalt.err (!%p239_p6)
}
 0x131   :  { %s243_s18 = scalar_lea.hbm %s336_s3, 128 }
 0x132   :  { %p244_p7 = scmp.ne.s32.totalorder %s336_s3, %s243_s18  ;;  %p247_p8 = scmp.lt.u32.totalorder %s243_s18, %s336_s3 }
 0x134   :  { %p249_p9 = pnand %p247_p8, %p244_p7 }
 0x136   :  { %252 = shalt.err (!%p249_p9)
}
 0x137   :  { %160 = dma.vmem_to_hbm [thread:$0]  %s302_s28, 128, %s336_s3, [#allocation7]  }
 0x138   :  { %255 = dma.done.wait [#allocation4], 128  }
 0x139   :  { %256 = vsyncadd [#allocation4], 4294967168 }
 0x13a   :  { %257 = dma.done.wait [#allocation7], 128  }
 0x13b   :  { %258 = vsyncadd [#allocation7], 4294967168 }
 0x13c   :  { %167 = vsyncpa [#allocation3], 1 }
 0x13d   :  { %168 = vsyncpa [#allocation4], 1 }
 0x13e   :  { %169 = vsyncpa [#allocation7], 1 }

</bundles_post_ra>
